<compile_context>
chip_gen: v5e
topology: v5e:2x2
jax: 0.10.0
libtpu: 0.0.40
codegen_flags: <defaults>
</compile_context>

<pallas_src>
import functools

import jax
import jax.numpy as jnp
from jax.experimental import pallas as pl
from jax.experimental.pallas import tpu as pltpu


def _cdiv(a, b):
    return (a + b - 1) // b


def _round_up(x, m):
    return _cdiv(x, m) * m


# ---------------------------------------------------------------------------
# Kernel
# ---------------------------------------------------------------------------
def nlk_projection_kernel(
    oc_ref, oo_ref, xn_ref,
    w_first_ref, b12a_ref,
    w_mid_ref, b_mid_ref,
    w_out_ref, b_out_ref,
    out_ref,
):
    mxu_dtype = w_first_ref.dtype
    xn = xn_ref[...]
    # Fused (2*dim+group)-lane input built in VMEM — no wrapper-side HBM concat.
    x_all = jnp.concatenate(
        [oc_ref[...], oo_ref[...], xn], axis=-1).astype(mxu_dtype)

    # One wide first matmul.  Columns [:2H]  = MLP1||MLP2 pre-activation,
    # columns [2H:] = x_new's additive contribution to the MLP3||MLP4 hidden.
    h_all = jnp.dot(x_all, w_first_ref[...],
                    preferred_element_type=jnp.float32)              # (tb, 4H)
    two_h = w_mid_ref.shape[0]
    h12 = jnp.maximum(h_all[:, :two_h] + b12a_ref[...], 0.0)         # (tb, 2H)

    # Pre-composed middle layer: (MLP1||MLP2 layer2) @ (MLP3||MLP4 layer1 zz-rows).
    h34 = jnp.dot(h12.astype(mxu_dtype), w_mid_ref[...],
                  preferred_element_type=jnp.float32)
    h34 = jnp.maximum(h34 + h_all[:, two_h:] + b_mid_ref[...], 0.0)  # (tb, 2H)

    # Output layer arranged as [new_center || new_offset].
    co = jnp.dot(h34.astype(mxu_dtype), w_out_ref[...],
                 preferred_element_type=jnp.float32) + b_out_ref[...]  # (tb, 2D)

    # Store [new_center || new_offset || x_new] directly (no wrapper concat).
    d2 = co.shape[-1]
    out_ref[:, :d2] = co.astype(out_ref.dtype)
    out_ref[:, d2:] = xn.astype(out_ref.dtype)


# ---------------------------------------------------------------------------
# Wrapper-side weight fusion / composition
# ---------------------------------------------------------------------------
def _fuse_params(params, dim, hidden_dim, group_num, mxu_dtype):
    (w1a, b1a, w1b, b1b,
     w2a, b2a, w2b, b2b,
     w3a, b3a, w3b, b3b,
     w4a, b4a, w4b, b4b) = params
    H, D, G = hidden_dim, dim, group_num

    def z(r, c):
        return jnp.zeros((r, c), jnp.float32)

    # --- layer-1 fusion: [oc||oo||xn] @ [[w12a, 0], [0, w34a_xn]] ------------
    w12a = jnp.block([[w1a, z(D, H)],
                      [z(D, H), w2a]])                              # (2D, 2H)
    w34a_xn = jnp.concatenate([w3a[2 * D:], w4a[2 * D:]], axis=1)   # (G, 2H)
    w_first = jnp.block([[w12a, z(2 * D, 2 * H)],
                         [z(G, 2 * H), w34a_xn]])                   # (2D+G, 4H)
    b12a = jnp.concatenate([b1a, b2a], axis=-1)                     # (1, 2H)

    # --- middle composition (no nonlinearity between the two affine maps) ----
    w12b = jnp.block([[w1b, z(H, D)],
                      [z(H, D), w2b]])                              # (2H, 2D)
    b12b = jnp.concatenate([b1b, b2b], axis=-1)                     # (1, 2D)
    w34a_zz = jnp.concatenate([w3a[:2 * D], w4a[:2 * D]], axis=1)   # (2D, 2H)
    b34a = jnp.concatenate([b3a, b4a], axis=-1)                     # (1, 2H)
    w_mid = jnp.dot(w12b, w34a_zz)                                  # (2H, 2H)
    b_mid = b34a + jnp.dot(b12b, w34a_zz)                           # (1, 2H)

    # --- output layer: columns ordered [new_center || new_offset] ------------
    # Hidden rows [:H] belong to MLP3 (-> new_offset), rows [H:] to MLP4.
    w_out = jnp.block([[z(H, D), w3b],
                       [w4b, z(H, D)]])                             # (2H, 2D)
    b_out = jnp.concatenate([b4b, b3b], axis=-1)                    # (1, 2D)

    return (w_first.astype(mxu_dtype), b12a,
            w_mid.astype(mxu_dtype), b_mid,
            w_out.astype(mxu_dtype), b_out)


# ---------------------------------------------------------------------------
# Entry point
# ---------------------------------------------------------------------------
@functools.partial(jax.jit, static_argnames=("tb", "mxu_dtype"))
def nlk_projection(origin_center, origin_offset, x_new, params,
                   *, tb=2048, mxu_dtype=jnp.bfloat16):
    B, dim = origin_center.shape
    group_num = x_new.shape[-1]
    hidden_dim = params[0].shape[1]
    out_dim = 2 * dim + group_num
    dtype = origin_center.dtype

    fused = _fuse_params(params, dim, hidden_dim, group_num, mxu_dtype)

    # Batch tile: as large as requested, but always >= 2 grid steps when B > 8
    # so the "parallel" batch axis shards across v7x's two TensorCores.
    tb_req = max(int(tb), 8)
    if B > 8:
        tb_eff = min(tb_req, _round_up(_cdiv(B, 2), 8))
    else:
        tb_eff = 8
    grid = (_cdiv(B, tb_eff),)          # ragged tail -> masked boundary writeback

    def batch_spec(feat):
        return pl.BlockSpec((tb_eff, feat), lambda i: (i, 0))

    def full_spec(arr):
        return pl.BlockSpec(arr.shape, lambda i: (0, 0))

    # Advisory cost hint for XLA scheduling around the call.
    flops = 2 * B * (out_dim * 4 * hidden_dim
                     + (2 * hidden_dim) * (2 * hidden_dim)
                     + (2 * hidden_dim) * (2 * dim))
    act_itemsize = jnp.dtype(dtype).itemsize
    w_itemsize = jnp.dtype(mxu_dtype).itemsize
    bytes_accessed = (B * out_dim * act_itemsize * 2
                      + (out_dim * 4 * hidden_dim
                         + (2 * hidden_dim) ** 2
                         + 2 * hidden_dim * 2 * dim) * w_itemsize
                      + (4 * hidden_dim + 2 * dim) * 4)

    out = pl.pallas_call(
        nlk_projection_kernel,
        out_shape=jax.ShapeDtypeStruct((B, out_dim), dtype),
        grid_spec=pl.GridSpec(
            grid=grid,
            in_specs=[batch_spec(dim), batch_spec(dim), batch_spec(group_num)]
                     + [full_spec(p) for p in fused],
            out_specs=pl.BlockSpec((tb_eff, out_dim), lambda i: (i, 0)),
        ),
        compiler_params=pltpu.CompilerParams(
            dimension_semantics=("parallel",)),
        cost_estimate=pl.CostEstimate(
            flops=int(flops), transcendentals=0,
            bytes_accessed=int(bytes_accessed)),
    )(origin_center, origin_offset, x_new, *fused)
    return out


# ---------------------------------------------------------------------------
# Init (mirrors TwoLayerNet.__init__) + plain-JAX reference
# ---------------------------------------------------------------------------
def init_two_layer(key, in_dim, hidden_dim, out_dim):
    """Xavier-uniform weights (pre-transposed to (in,out)); PyTorch-default biases."""
    k1, k2, k3, k4 = jax.random.split(key, 4)

    def xavier(k, fan_in, fan_out):
        bound = jnp.sqrt(6.0 / (fan_in + fan_out))
        w = jax.random.uniform(k, (fan_out, fan_in), jnp.float32, -bound, bound)
        return w.T

    def bias(k, fan_in, fan_out):
        bound = 1.0 / jnp.sqrt(jnp.float32(fan_in))
        return jax.random.uniform(k, (1, fan_out), jnp.float32, -bound, bound)

    return (xavier(k1, in_dim, hidden_dim), bias(k2, in_dim, hidden_dim),
            xavier(k3, hidden_dim, out_dim), bias(k4, hidden_dim, out_dim))


def init_nlk_projection(key, dim, hidden_dim, group_num):
    concat_dim = 2 * dim + group_num
    k1, k2, k3, k4 = jax.random.split(key, 4)
    p1 = init_two_layer(k1, dim, hidden_dim, dim)
    p2 = init_two_layer(k2, dim, hidden_dim, dim)
    p3 = init_two_layer(k3, concat_dim, hidden_dim, dim)
    p4 = init_two_layer(k4, concat_dim, hidden_dim, dim)
    return p1 + p2 + p3 + p4


def _two_layer_ref(x, wa, ba, wb, bb):
    h = jnp.maximum(jnp.dot(x, wa) + ba, 0.0)
    return jnp.dot(h, wb) + bb


def reference_forward(origin_center, origin_offset, x_new, params):
    (w1a, b1a, w1b, b1b,
     w2a, b2a, w2b, b2b,
     w3a, b3a, w3b, b3b,
     w4a, b4a, w4b, b4b) = params
    z1 = _two_layer_ref(origin_center, w1a, b1a, w1b, b1b)
    z2 = _two_layer_ref(origin_offset, w2a, b2a, w2b, b2b)
    fi = jnp.concatenate([z1, z2, x_new], axis=-1)
    new_offset = _two_layer_ref(fi, w3a, b3a, w3b, b3b)
    new_center = _two_layer_ref(fi, w4a, b4a, w4b, b4b)
    return jnp.concatenate([new_center, new_offset, x_new], axis=-1)


if __name__ == "__main__":
    dim, hidden_dim, group_num = 32, 64, 8
    key = jax.random.PRNGKey(0)
    kp, kc, ko, kx = jax.random.split(key, 4)
    params = init_nlk_projection(kp, dim, hidden_dim, group_num)

    # Case 1: small batch (two grid steps).  f32 MXU operands validate the
    # algebraic fusion exactly; default bf16 operands checked with a looser
    # tolerance (f32 accumulation, tiny dims -> small error).
    B = 16
    oc = jax.random.normal(kc, (B, dim), jnp.float32)
    oo = jax.random.normal(ko, (B, dim), jnp.float32)
    xn = jax.random.normal(kx, (B, group_num), jnp.float32)
    ref = reference_forward(oc, oo, xn, params)

    out_f32 = jax.block_until_ready(
        nlk_projection(oc, oo, xn, params, mxu_dtype=jnp.float32))
    assert out_f32.shape == (B, 2 * dim + group_num)
    assert jnp.allclose(out_f32, ref, atol=1e-4, rtol=1e-4), "mismatch (f32 MXU)"

    out_bf16 = jax.block_until_ready(nlk_projection(oc, oo, xn, params))
    assert jnp.allclose(out_bf16, ref, atol=1e-1, rtol=1e-1), "mismatch (bf16 MXU)"

    # Case 2: ragged batch, multi-step grid, masked boundary writeback (no pad).
    B2 = 200
    oc2 = jax.random.normal(jax.random.fold_in(kc, 1), (B2, dim), jnp.float32)
    oo2 = jax.random.normal(jax.random.fold_in(ko, 1), (B2, dim), jnp.float32)
    xn2 = jax.random.normal(jax.random.fold_in(kx, 1), (B2, group_num), jnp.float32)
    ref2 = reference_forward(oc2, oo2, xn2, params)
    out2 = jax.block_until_ready(
        nlk_projection(oc2, oo2, xn2, params, tb=64, mxu_dtype=jnp.float32))
    assert out2.shape == (B2, 2 * dim + group_num)
    assert jnp.allclose(out2, ref2, atol=1e-4, rtol=1e-4), "mismatch (B=200)"

    print("KERNEL_OK")
</pallas_src>

<mosaic_0001>
module attributes {stable_mosaic.version = 11 : i64} {
  func.func @nlk_projection_kernel(%arg0: i32, %arg1: memref<8x32xf32, #tpu.memory_space<vmem>>, %arg2: memref<8x32xf32, #tpu.memory_space<vmem>>, %arg3: memref<8x8xf32, #tpu.memory_space<vmem>>, %arg4: memref<72x256xf32, #tpu.memory_space<vmem>>, %arg5: memref<1x128xf32, #tpu.memory_space<vmem>>, %arg6: memref<128x128xf32, #tpu.memory_space<vmem>>, %arg7: memref<1x128xf32, #tpu.memory_space<vmem>>, %arg8: memref<128x64xf32, #tpu.memory_space<vmem>>, %arg9: memref<1x64xf32, #tpu.memory_space<vmem>>, %arg10: memref<8x72xf32, #tpu.memory_space<vmem>>) attributes {dimension_semantics = [#tpu.dimension_semantics<parallel>], iteration_bounds = array<i64: 2>, scalar_prefetch = 0 : i64, scratch_operands = 0 : i64, tpu.core_type = #tpu.core_type<tc>, window_params = [{transform_indices = @transform_0, window_bounds = array<i64: 8, 32>}, {transform_indices = @transform_1, window_bounds = array<i64: 8, 32>}, {transform_indices = @transform_2, window_bounds = array<i64: 8, 8>}, {pipeline_mode = #tpu.pipeline_mode<synchronous>, transform_indices = @transform_3, window_bounds = array<i64: 72, 256>}, {pipeline_mode = #tpu.pipeline_mode<synchronous>, transform_indices = @transform_4, window_bounds = array<i64: 1, 128>}, {pipeline_mode = #tpu.pipeline_mode<synchronous>, transform_indices = @transform_5, window_bounds = array<i64: 128, 128>}, {pipeline_mode = #tpu.pipeline_mode<synchronous>, transform_indices = @transform_6, window_bounds = array<i64: 1, 128>}, {pipeline_mode = #tpu.pipeline_mode<synchronous>, transform_indices = @transform_7, window_bounds = array<i64: 128, 64>}, {pipeline_mode = #tpu.pipeline_mode<synchronous>, transform_indices = @transform_8, window_bounds = array<i64: 1, 64>}, {transform_indices = @transform_9, window_bounds = array<i64: 8, 72>}]} {
    %c0 = arith.constant 0 : index
    %c0_0 = arith.constant 0 : index
    %0 = vector.load %arg3[%c0, %c0_0] : memref<8x8xf32, #tpu.memory_space<vmem>>, vector<8x8xf32>
    %c0_1 = arith.constant 0 : index
    %c0_2 = arith.constant 0 : index
    %1 = vector.load %arg1[%c0_1, %c0_2] : memref<8x32xf32, #tpu.memory_space<vmem>>, vector<8x32xf32>
    %c0_3 = arith.constant 0 : index
    %c0_4 = arith.constant 0 : index
    %2 = vector.load %arg2[%c0_3, %c0_4] : memref<8x32xf32, #tpu.memory_space<vmem>>, vector<8x32xf32>
    %3 = tpu.concatenate %1, %2, %0 in 1 : vector<8x32xf32>, vector<8x32xf32>, vector<8x8xf32> -> vector<8x72xf32>
    %c0_5 = arith.constant 0 : index
    %c0_6 = arith.constant 0 : index
    %4 = vector.load %arg4[%c0_5, %c0_6] : memref<72x256xf32, #tpu.memory_space<vmem>>, vector<72x256xf32>
    %cst = arith.constant dense<0.000000e+00> : vector<8x256xf32>
    %5 = tpu.matmul %3, %4, %cst {dimension_numbers = #tpu.dot_dimension_numbers<[1], [0], [0], [1], [0, 0, 1, 1], [], []>} : vector<8x72xf32>, vector<72x256xf32>, vector<8x256xf32> -> vector<8x256xf32>
    %6 = vector.extract_strided_slice %5 {offsets = [0, 0], sizes = [8, 128], strides = [1, 1]} : vector<8x256xf32> to vector<8x128xf32>
    %c0_7 = arith.constant 0 : index
    %c0_8 = arith.constant 0 : index
    %7 = vector.load %arg5[%c0_7, %c0_8] : memref<1x128xf32, #tpu.memory_space<vmem>>, vector<1x128xf32>
    %8 = vector.broadcast %7 : vector<1x128xf32> to vector<8x128xf32>
    %9 = arith.addf %6, %8 : vector<8x128xf32>
    %cst_9 = arith.constant 0.000000e+00 : f32
    %10 = vector.broadcast %cst_9 : f32 to vector<8x128xf32>
    %11 = arith.maximumf %9, %10 : vector<8x128xf32>
    %c0_10 = arith.constant 0 : index
    %c0_11 = arith.constant 0 : index
    %12 = vector.load %arg6[%c0_10, %c0_11] : memref<128x128xf32, #tpu.memory_space<vmem>>, vector<128x128xf32>
    %cst_12 = arith.constant dense<0.000000e+00> : vector<8x128xf32>
    %13 = tpu.matmul %11, %12, %cst_12 {dimension_numbers = #tpu.dot_dimension_numbers<[1], [0], [0], [1], [0, 0, 1, 1], [], []>} : vector<8x128xf32>, vector<128x128xf32>, vector<8x128xf32> -> vector<8x128xf32>
    %14 = vector.extract_strided_slice %5 {offsets = [0, 128], sizes = [8, 128], strides = [1, 1]} : vector<8x256xf32> to vector<8x128xf32>
    %15 = arith.addf %13, %14 : vector<8x128xf32>
    %c0_13 = arith.constant 0 : index
    %c0_14 = arith.constant 0 : index
    %16 = vector.load %arg7[%c0_13, %c0_14] : memref<1x128xf32, #tpu.memory_space<vmem>>, vector<1x128xf32>
    %17 = vector.broadcast %16 : vector<1x128xf32> to vector<8x128xf32>
    %18 = arith.addf %15, %17 : vector<8x128xf32>
    %cst_15 = arith.constant 0.000000e+00 : f32
    %19 = vector.broadcast %cst_15 : f32 to vector<8x128xf32>
    %20 = arith.maximumf %18, %19 : vector<8x128xf32>
    %c0_16 = arith.constant 0 : index
    %c0_17 = arith.constant 0 : index
    %21 = vector.load %arg8[%c0_16, %c0_17] : memref<128x64xf32, #tpu.memory_space<vmem>>, vector<128x64xf32>
    %cst_18 = arith.constant dense<0.000000e+00> : vector<8x64xf32>
    %22 = tpu.matmul %20, %21, %cst_18 {dimension_numbers = #tpu.dot_dimension_numbers<[1], [0], [0], [1], [0, 0, 1, 1], [], []>} : vector<8x128xf32>, vector<128x64xf32>, vector<8x64xf32> -> vector<8x64xf32>
    %c0_19 = arith.constant 0 : index
    %c0_20 = arith.constant 0 : index
    %23 = vector.load %arg9[%c0_19, %c0_20] : memref<1x64xf32, #tpu.memory_space<vmem>>, vector<1x64xf32>
    %24 = vector.broadcast %23 : vector<1x64xf32> to vector<8x64xf32>
    %25 = arith.addf %22, %24 : vector<8x64xf32>
    %c0_21 = arith.constant 0 : index
    %c0_22 = arith.constant 0 : index
    %26 = vector.load %arg10[%c0_21, %c0_22] : memref<8x72xf32, #tpu.memory_space<vmem>>, vector<8x64xf32>
    tpu.vector_store %arg10[%c0_21, %c0_22], %25 {strides = array<i32>} : memref<8x72xf32, #tpu.memory_space<vmem>>, vector<8x64xf32>,
    %c0_23 = arith.constant 0 : index
    %c64 = arith.constant 64 : index
    %27 = vector.load %arg10[%c0_23, %c64] : memref<8x72xf32, #tpu.memory_space<vmem>>, vector<8x8xf32>
    tpu.vector_store %arg10[%c0_23, %c64], %0 {strides = array<i32>} : memref<8x72xf32, #tpu.memory_space<vmem>>, vector<8x8xf32>,
    return
  }
  func.func @transform_0(%arg0: i32) -> (i32, i32) {
    %c0_i32 = arith.constant 0 : i32
    %c0_i32_0 = arith.constant 0 : i32
    return %arg0, %c0_i32 : i32, i32
  }
  func.func @transform_1(%arg0: i32) -> (i32, i32) {
    %c0_i32 = arith.constant 0 : i32
    %c0_i32_0 = arith.constant 0 : i32
    return %arg0, %c0_i32 : i32, i32
  }
  func.func @transform_2(%arg0: i32) -> (i32, i32) {
    %c0_i32 = arith.constant 0 : i32
    %c0_i32_0 = arith.constant 0 : i32
    return %arg0, %c0_i32 : i32, i32
  }
  func.func @transform_3(%arg0: i32) -> (i32, i32) {
    %c0_i32 = arith.constant 0 : i32
    %c0_i32_0 = arith.constant 0 : i32
    %c0_i32_1 = arith.constant 0 : i32
    return %c0_i32, %c0_i32_0 : i32, i32
  }
  func.func @transform_4(%arg0: i32) -> (i32, i32) {
    %c0_i32 = arith.constant 0 : i32
    %c0_i32_0 = arith.constant 0 : i32
    %c0_i32_1 = arith.constant 0 : i32
    return %c0_i32, %c0_i32_0 : i32, i32
  }
  func.func @transform_5(%arg0: i32) -> (i32, i32) {
    %c0_i32 = arith.constant 0 : i32
    %c0_i32_0 = arith.constant 0 : i32
    %c0_i32_1 = arith.constant 0 : i32
    return %c0_i32, %c0_i32_0 : i32, i32
  }
  func.func @transform_6(%arg0: i32) -> (i32, i32) {
    %c0_i32 = arith.constant 0 : i32
    %c0_i32_0 = arith.constant 0 : i32
    %c0_i32_1 = arith.constant 0 : i32
    return %c0_i32, %c0_i32_0 : i32, i32
  }
  func.func @transform_7(%arg0: i32) -> (i32, i32) {
    %c0_i32 = arith.constant 0 : i32
    %c0_i32_0 = arith.constant 0 : i32
    %c0_i32_1 = arith.constant 0 : i32
    return %c0_i32, %c0_i32_0 : i32, i32
  }
  func.func @transform_8(%arg0: i32) -> (i32, i32) {
    %c0_i32 = arith.constant 0 : i32
    %c0_i32_0 = arith.constant 0 : i32
    %c0_i32_1 = arith.constant 0 : i32
    return %c0_i32, %c0_i32_0 : i32, i32
  }
  func.func @transform_9(%arg0: i32) -> (i32, i32) {
    %c0_i32 = arith.constant 0 : i32
    %c0_i32_0 = arith.constant 0 : i32
    return %arg0, %c0_i32 : i32, i32
  }
}

</mosaic_0001>

<bundles_post_ra>
// kernel: nlk_projection.1
= control target key start
LH: loop header
LB: loop body
LE: loop exit
PB: predicated region body
PF: predicated region fallthrough
CT: control target
= control target key end

     0   :  { %s1064_s0 = inlined_call_operand.vmem [shape: f32[16,32], index: 0, kind: input, shape index: {}]   ;;  %s1065_s1 = inlined_call_operand.vmem [shape: f32[16,32], index: 1, kind: input, shape index: {}]   ;;  %s1066_s2 = inlined_call_operand.vmem [shape: f32[16,8], index: 2, kind: input, shape index: {}]   ;;  %s1067_s3 = inlined_call_operand.vmem [shape: f32[72,256], index: 3, kind: input, shape index: {}]   ;;  %s1068_s4 = inlined_call_operand.vmem [shape: f32[1,128], index: 4, kind: input, shape index: {}]   ;;  %s1069_s5 = inlined_call_operand.vmem [shape: f32[128,128], index: 5, kind: input, shape index: {}]   ;;  %s1070_s6 = inlined_call_operand.vmem [shape: f32[1,128], index: 6, kind: input, shape index: {}]   ;;  %s1071_s7 = inlined_call_operand.vmem [shape: f32[128,64], index: 7, kind: input, shape index: {}]   ;;  %s1072_s8 = inlined_call_operand.vmem [shape: f32[1,64], index: 8, kind: input, shape index: {}]   ;;  %s1073_s9 = inlined_call_operand.hbm [shape: f32[16,72], index: 9, kind: output, shape index: {}]  }
   0x1   :  { %1074 = sst [smem:[#allocation5_spill]] %s1065_s1 }
   0x2   :  { %14 = vsyncpa [#allocation3], 0 }
   0x3   :  { %16 = vsyncpa [#allocation3 + $0x1], 0  ;;  %s803_s30 = smov 0   ;;  %s805_s10 = smov 0  }
   0x4   :  { %s807_s11 = smov 0   ;;  %s809_s12 = smov 0  }
   0x5 LB: > { %s824_s13 = sadd.s32 4294967295, %s749_s12   ;;  %s629_s14 = sadd.s32 4294967294, %s749_s12   ;;  %s749_s12 = sphi %s809_s12, %s1081_s12   ;;  %s745_s11 = sphi %s807_s11, %s1080_s11   ;;  %s741_s10 = sphi %s805_s10, %s1079_s10   ;;  %s737_s30 = sphi %s803_s30, %s1078_s30  }
   0x6   : > { %s828_s15 = sadd.s32 1, %s749_s12   ;;  %s233_s16 = sadd.s32 1, %s745_s11 }
   0x7   : > { %s230_s17 = ssub.s32 %s749_s12, %s828_s15  ;;  %p243_p0 = scmp.ne.s32.totalorder %s745_s11, %s741_s10 }
   0x8   : > { %p231_p1 = scmp.eq.s32.totalorder %s230_s17, 0  ;;  %p244_p2 = scmp.eq.s32.totalorder %s824_s13, 1 }
   0x9   : > { %p249_p3 = scmp.ne.s32.totalorder %s741_s10, %s737_s30  ;;  %p250_p4 = scmp.eq.s32.totalorder %s629_s14, 1 }
   0xa   : > { %s839_s18 = scalar_select %p231_p1, %s745_s11, %s233_s16  }
   0xb   : > { %p841_p5 = por %p244_p2, %p243_p0  ;;  %p845_p6 = por %p250_p4, %p249_p3 }
   0xc   : > { %p632_p7 = scmp.ge.s32.totalorder %s749_s12, 1  ;;  %p307_p8 = scmp.lt.s32.totalorder %s749_s12, 3 }
   0xe   : > { %p308_p9 = pnand %p632_p7, %p307_p8 }
   0xf   : > { %p350_p10 = scmp.lt.s32.totalorder (!%p308_p9), %s824_s13, 1  ;;  %s1077_s1 = sld [smem:[#allocation5_spill]] (!%p308_p9) }
  0x10   : > { %311 = sbr.rel (%p308_p9) target bundleno = 557 (0x22d), region = 56  ;;  %s751_s16 = smov (!%p308_p9), 32  }
  0x11   : > { %s752_s23 = smov (!%p308_p9), 64   ;;  %s640_s28 = sshll.u32 (!%p308_p9), %s824_s13, 3 }
  0x12   : > { %s707_s14 = scalar_lea.hbm (!%p308_p9), %s1073_s9, 16 }
  0x15   : > { %v393_v0 = vld [vmem:[%s1067_s3 + $0x80] sm:$0xff]  ;;  %v394_v1 = vld [vmem:[%s1067_s3 + $0x88] sm:$0xff]  ;;  %v391_v2 = vld [vmem:[%s1067_s3 + $0x70] sm:$0xff]  ;;  %s351_s29 = scalar_select %p350_p10, %s824_s13, 1  ;;  %vm373_vm0 = vcmask 261120   ;;  %vm375_vm1 = vcmask 523264  }
  0x16   : > { %406 = vmatpush.msra.mxu0 %v393_v0  ;;  %426 = vmatpush.msra.mxu1 %v394_v1  ;;  %v392_v3 = vld [vmem:[%s1067_s3 + $0x78] sm:$0xff]  ;;  %v389_v4 = vld [vmem:[%s1067_s3 + $0x60] sm:$0xff]  ;;  %v390_v5 = vld [vmem:[%s1067_s3 + $0x68] sm:$0xff]  ;;  %vm395_vm2 = vcmask 588800   ;;  %vm528_vm3 = vcmask 589312  }
  0x17   : > { %s871_s22 = sshll.u32 %s351_s29, 3  ;;  %v387_v6 = vld [vmem:[%s1067_s3 + $0x50] sm:$0xff]  ;;  %v388_v7 = vld [vmem:[%s1067_s3 + $0x58] sm:$0xff]  ;;  %v385_v10 = vld [vmem:[%s1067_s3 + $0x40] sm:$0xff]  ;;  %s541_s29 = scalar_lea.hbm %s1073_s9, %s640_s28 }
  0x18   : > { %407 = vmatpush.msra.mxu0 %v391_v2  ;;  %427 = vmatpush.msra.mxu1 %v392_v3  ;;  %s357_s27 = scalar_lea.vmem %s1077_s1, %s871_s22  ;;  %s361_s21 = scalar_lea.vmem %s1066_s2, %s871_s22  ;;  %v386_v11 = vld [vmem:[%s1067_s3 + $0x48] sm:$0xff]  ;;  %v383_v12 = vld [vmem:[%s1067_s3 + $0x30] sm:$0xff]  ;;  %v384_v13 = vld [vmem:[%s1067_s3 + $0x38] sm:$0xff] }
  0x19   : > { %v364_v8 = vld [vmem:[%s357_s27] sm:$0xff]  ;;  %v382_v15 = vld [vmem:[%s1067_s3 + $0x28] sm:$0xff]  ;;  %v379_v16 = vld [vmem:[%s1067_s3 + $0x10] sm:$0xff]  ;;  %s353_s1 = scalar_lea.vmem %s1064_s0, %s871_s22  ;;  %s347_s22 = sand.u32 1, %s741_s10  }
  0x1a   : > { %408 = vmatpush.msra.mxu0 %v389_v4  ;;  %428 = vmatpush.msra.mxu1 %v390_v5  ;;  %v362_v9 = vld [vmem:[%s361_s21] sm:$0xff]  ;;  %v380_v17 = vld [vmem:[%s1067_s3 + $0x18] sm:$0xff]  ;;  %v378_v19 = vld [vmem:[%s1067_s3 + $0x8] sm:$0xff]  ;;  %s633_s27 = sshll.u32 %s347_s22, 3  ;;  %s545_s24 = sshll.u32 %s541_s29, 4  ;;  %s546_s24 = int_to_ptr.hbm [resolvable:$true] %s545_s24 }
  0x1b   : > { %366 = vrot.lane.b32.xlu0 %v364_v8, %s751_s16  ;;  %v381_v14 = vld [vmem:[%s1067_s3 + $0x20] sm:$0xff]  ;;  %v460_v20 = vld [vmem:[%s1069_s5 + $0x78] sm:$0xff]  ;;  %v459_v21 = vld [vmem:[%s1069_s5 + $0x70] sm:$0xff]  ;;  %s531_s13 = scalar_lea.sflag [#allocation3], %s347_s22  ;;  %s701_s25 = sshra.s32 %s546_s24, 4  ;;  %s702_s25 = int_to_ptr.hbm [resolvable:$true] %s701_s25 }
  0x1c   : > { %409 = vmatpush.msra.mxu0 %v387_v6  ;;  %429 = vmatpush.msra.mxu1 %v388_v7  ;;  %v377_v18 = vld [vmem:[%s1067_s3] sm:$0xff]  ;;  %v458_v22 = vld [vmem:[%s1069_s5 + $0x68] sm:$0xff]  ;;  %v456_v24 = vld [vmem:[%s1069_s5 + $0x58] sm:$0xff]  ;;  %s703_s26 = scalar_lea.hbm %s702_s25, 8  ;;  %p708_p0 = scmp.lt.s32.totalorder %s702_s25, %s1073_s9 }
  0x1d   : > { %461 = vmatpush.msra.mxu2 %v460_v20  ;;  %v457_v23 = vld [vmem:[%s1069_s5 + $0x60] sm:$0xff]  ;;  %v455_v25 = vld [vmem:[%s1069_s5 + $0x50] sm:$0xff]  ;;  %v454_v26 = vld [vmem:[%s1069_s5 + $0x48] sm:$0xff]  ;;  %p704_p11 = scmp.ne.s32.totalorder %s702_s25, %s703_s26  ;;  %p709_p1 = scmp.lt.s32.totalorder %s707_s14, %s703_s26 }
  0x1e   : > { %410 = vmatpush.msra.mxu0 %v385_v10  ;;  %430 = vmatpush.msra.mxu1 %v386_v11  ;;  %v453_v27 = vld [vmem:[%s1069_s5 + $0x40] sm:$0xff]  ;;  %v452_v28 = vld [vmem:[%s1069_s5 + $0x38] sm:$0xff]  ;;  %v451_v29 = vld [vmem:[%s1069_s5 + $0x30] sm:$0xff] }
  0x1f   : > { %462 = vmatpush.msra.mxu2 %v459_v21  ;;  %v450_v30 = vld [vmem:[%s1069_s5 + $0x28] sm:$0xff]  ;;  %v449_v31 = vld [vmem:[%s1069_s5 + $0x20] sm:$0xff]  ;;  %v448_v33 = vld [vmem:[%s1069_s5 + $0x18] sm:$0xff]  ;;  %p705_p12 = pnand %p704_p11, %p841_p5  ;;  %p710_p2 = por %p709_p1, %p708_p0 }
  0x20   : > { %411 = vmatpush.msra.mxu0 %v383_v12  ;;  %431 = vmatpush.msra.mxu1 %v384_v13  ;;  %v363_v34 = vld [vmem:[%s353_s1] sm:$0xff]  ;;  %v447_v38 = vld [vmem:[%s1069_s5 + $0x10] sm:$0xff]  ;;  %v446_v39 = vld [vmem:[%s1069_s5 + $0x8] sm:$0xff] }
  0x21   : > { %463 = vmatpush.msra.mxu2 %v458_v22  ;;  %v445_v40 = vld [vmem:[%s1069_s5] sm:$0xff]  ;;  %v502_v41 = vld [vmem:[%s1071_s7 + $0x78] sm:$0xff]  ;;  %v501_v42 = vld [vmem:[%s1071_s7 + $0x70] sm:$0xff]  ;;  %p706_p13 = pneg %p705_p12 }
  0x22   : > { %412 = vmatpush.msra.mxu0 %v381_v14  ;;  %432 = vmatpush.msra.mxu1 %v382_v15  ;;  %v500_v43 = vld [vmem:[%s1071_s7 + $0x68] sm:$0xff]  ;;  %v499_v44 = vld [vmem:[%s1071_s7 + $0x60] sm:$0xff]  ;;  %v498_v45 = vld [vmem:[%s1071_s7 + $0x58] sm:$0xff] }
  0x23   : > { %370 = vrot.lane.b32.xlu0 %v362_v9, %s752_s23  ;;  %464 = vmatpush.msra.mxu2 %v457_v23  ;;  %v497_v46 = vld [vmem:[%s1071_s7 + $0x50] sm:$0xff]  ;;  %v496_v47 = vld [vmem:[%s1071_s7 + $0x48] sm:$0xff]  ;;  %v495_v48 = vld [vmem:[%s1071_s7 + $0x40] sm:$0xff]  ;;  %s349_s23 = scalar_lea.vmem [#allocation2], %s633_s27  ;;  %p711_p3 = pnand %p710_p2, %p706_p13 }
  0x24   : > { %413 = vmatpush.msra.mxu0 %v379_v16  ;;  %433 = vmatpush.msra.mxu1 %v380_v17  ;;  %v494_v49 = vld [vmem:[%s1071_s7 + $0x38] sm:$0xff]  ;;  %v493_v50 = vld [vmem:[%s1071_s7 + $0x30] sm:$0xff]  ;;  %v492_v51 = vld [vmem:[%s1071_s7 + $0x28] sm:$0xff]  ;;  %s543_s1 = sshll.u32 %s349_s23, 4  ;;  %s544_s1 = int_to_ptr.vmem [resolvable:$true] %s543_s1 }
  0x25   : > { %465 = vmatpush.msra.mxu2 %v456_v24  ;;  %507 = vmatpush.msra.mxu3 %v502_v41  ;;  %v491_v52 = vld [vmem:[%s1071_s7 + $0x20] sm:$0xff]  ;;  %v490_v57 = vld [vmem:[%s1071_s7 + $0x18] sm:$0xff]  ;;  %v489_v58 = vld [vmem:[%s1071_s7 + $0x10] sm:$0xff] }
  0x26   : > { %414 = vmatpush.msra.mxu0 %v377_v18  ;;  %434 = vmatpush.msra.mxu1 %v378_v19  ;;  %v684_v53 = vld [vmem:[%s1068_s4] ss:$0 sm:$0xff]  ;;  %v488_v59 = vld [vmem:[%s1071_s7 + $0x8] sm:$0xff] }
  0x27   : > { %466 = vmatpush.msra.mxu2 %v455_v25  ;;  %508 = vmatpush.msra.mxu3 %v501_v42  ;;  %v487_v60 = vld [vmem:[%s1071_s7] sm:$0xff] }
  0x28   : > { %v685_v61 = vld [vmem:[%s1070_s6] ss:$0 sm:$0xff] }
  0x29   : > { %467 = vmatpush.msra.mxu2 %v454_v26  ;;  %509 = vmatpush.msra.mxu3 %v500_v43  ;;  %v686_v3 = vld [vmem:[%s1072_s8] ss:$0 sm:$0xff] }
  0x2b   : > { %468 = vmatpush.msra.mxu2 %v453_v27  ;;  %510 = vmatpush.msra.mxu3 %v499_v44 }
  0x2d   : > { %469 = vmatpush.msra.mxu2 %v452_v28  ;;  %511 = vmatpush.msra.mxu3 %v498_v45 }
  0x2f   : > { %470 = vmatpush.msra.mxu2 %v451_v29  ;;  %512 = vmatpush.msra.mxu3 %v497_v46 }
  0x31   : > { %471 = vmatpush.msra.mxu2 %v450_v30  ;;  %513 = vmatpush.msra.mxu3 %v496_v47 }
  0x33   : > { %472 = vmatpush.msra.mxu2 %v449_v31  ;;  %514 = vmatpush.msra.mxu3 %v495_v48 }
  0x35   : > { %473 = vmatpush.msra.mxu2 %v448_v33  ;;  %515 = vmatpush.msra.mxu3 %v494_v49 }
  0x37   : > { %474 = vmatpush.msra.mxu2 %v447_v38  ;;  %516 = vmatpush.msra.mxu3 %v493_v50 }
  0x39   : > { %475 = vmatpush.msra.mxu2 %v446_v39  ;;  %517 = vmatpush.msra.mxu3 %v492_v51 }
  0x3b   : > { %476 = vmatpush.msra.mxu2 %v445_v40  ;;  %518 = vmatpush.msra.mxu3 %v491_v52 }
  0x3d   : > { %519 = vmatpush.msra.mxu3 %v490_v57 }
  0x3f   : > { %520 = vmatpush.msra.mxu3 %v489_v58 }
  0x41   : > { %521 = vmatpush.msra.mxu3 %v488_v59 }
  0x43   : > { %522 = vmatpush.msra.mxu3 %v487_v60 }
  0x8d   : > { %v367_v32 = vpop.permute.xlu0 %366 }
  0x8e   : > { %v374_v35 = vsel %vm373_vm0, %v363_v34, %v367_v32 }
  0x95   : > { %v960_v36 = vpop.permute.xlu0 %370 }
  0x96   : > { %v376_v37 = vsel %vm375_vm1, %v374_v35, %v960_v36 }
  0x97   : > { %637 = vmatmul.msk.f32.vlgmr.msra.gmra.mxu0 %vm395_vm2, %v376_v37  ;;  %638 = vmatmul.msk.f32.vlgmr.msra.gmra.mxu1 %vm395_vm2, %v376_v37 }
 0x114   : > { %v416_v54 = vpop.f32.mrf.mxu0  ;;  %v436_v62 = vpop.f32.mrf.mxu1 }
 0x115   : > { %v443_v55 = vadd.f32 %v684_v53, %v416_v54 }
 0x117   : > { %v444_v56 = vmax.f32 %v443_v55, 0.0 }
 0x119   : > { %477 = vmatmul.f32.vlgmr.msra.gmra.mxu2 %v444_v56 }
 0x19c   : > { %v478_v63 = vpop.f32.mrf.mxu2 }
 0x19d   : > { %v479_v0 = vadd.f32 %v478_v63, %v436_v62 }
 0x19f   : > { %v485_v1 = vadd.f32 %v685_v61, %v479_v0 }
 0x1a1   : > { %v486_v2 = vmax.f32 %v485_v1, 0.0 }
 0x1a3   : > { %523 = vmatmul.f32.vlgmr.msra.gmra.mxu3 %v486_v2 }
 0x226   : > { %v524_v4 = vpop.f32.mrf.mxu3 }
 0x227   : > { %v525_v5 = vadd.f32 %v686_v3, %v524_v4 }
 0x229   : > { %527 = vst.msk [vmem:[%s349_s23] sm:$0xff] %vm375_vm1, %v525_v5 }
 0x22a   : > { %529 = vst.msk [vmem:[%s349_s23] sm:$0xff] %vm528_vm3, %v960_v36 }
 0x22b   : > { %714 = shalt.err (!%p711_p3)
}
 0x22c   : > { %643 = dma.vmem_to_hbm [thread:$0]  (%p841_p5), %s544_s1, 128, %s546_s24, %s531_s13  }
 0x22d PF: > { %p649_p4 = scmp.ge.s32.totalorder %s749_s12, 2  ;;  %s557_s22 = sand.u32 1, %s737_s30  }
 0x22e   : > { %s558_s17 = scalar_lea.sflag [#allocation3], %s557_s22 }
 0x22f   : > { %p646_p7 = pnand %p649_p4, %p845_p6 }
 0x231   : > { %p647_p8 = pneg %p646_p7 }
 0x233   : > { %732 = dma.done.wait (%p647_p8), %s558_s17, 128  }
 0x234   : > { %734 = vsyncadd (%p647_p8), %s558_s17, 4294967168  ;;  %p19_p9 = scmp.ge.s32.totalorder %s828_s15, 4   ;;  %s1078_s30 = smov %s741_s10 }
 0x235   : > { %s1079_s10 = smov %s745_s11  ;;  %s1080_s11 = smov %s839_s18 }
 0x236   : > { %s1081_s12 = smov %s828_s15  ;;  %21 = sbr.rel (!%p19_p9) target bundleno = 5 (0x5), region = 97 }
 0x23b   :  { %564 = vsyncpa [#allocation3], 1 }
 0x23c   :  { %566 = vsyncpa [#allocation3 + $0x1], 1 }

</bundles_post_ra>
